<compile_context>
chip_gen: v6e
topology: v6e:2x2x1
jax: 0.10.0
libtpu: 0.0.40
codegen_flags: <defaults>
</compile_context>

<pallas_src>
import jax
import jax.numpy as jnp
from jax import lax
from jax.experimental import pallas as pl
from jax.experimental.pallas import tpu as pltpu


def _round_up(x, m):
    return ((x + m - 1) // m) * m


# ---------------------------------------------------------------------------
# Kernel A (only when D >= 128): tiled per-node scores  s = x @ [Wu | Wv]
# ---------------------------------------------------------------------------
def _node_scores_kernel(x_ref, w_ref, s_ref):
    s_ref[...] = jnp.dot(x_ref[...], w_ref[...],
                         preferred_element_type=jnp.float32)


# ---------------------------------------------------------------------------
# Kernel B (two-pass path, pass 1): shifted sum / sum-of-squares reduction.
#   scal_ref (SMEM f32[2]) = [n_valid, shift_c];  slab pads equal shift_c.
#   Per-tile work is pure VPU (adds into an (8,128) scratch); the single
#   cross-lane/sublane XLU reduce + variance/rsqrt run only at the last tile.
# ---------------------------------------------------------------------------
def _reduce_kernel(scal_ref, l_ref, mean_ref, inv_ref, sum_scr, sq_scr):
    t = pl.program_id(0)

    @pl.when(t == 0)
    def _init():
        sum_scr[...] = jnp.zeros_like(sum_scr)
        sq_scr[...] = jnp.zeros_like(sq_scr)

    c = scal_ref[1]
    y = l_ref[...] - c                        # pads were filled with c -> y == 0
    y3 = y.reshape(-1, 8, 128)                # pure view: vreg-major split
    sum_scr[...] += jnp.sum(y3, axis=0)       # VPU adds only
    sq_scr[...] += jnp.sum(y3 * y3, axis=0)

    @pl.when(t == pl.num_programs(0) - 1)
    def _finalize():
        n = scal_ref[0]
        s = jnp.sum(sum_scr[...])             # single XLU reduce at the end
        q = jnp.sum(sq_scr[...])
        mean = c + s / n
        var = (q - s * (s / n)) / (n - 1.0)   # shifted sums: no cancellation
        mean_ref[...] = jnp.reshape(mean, (1, 1))
        inv_ref[...] = jnp.reshape(lax.rsqrt(var), (1, 1))


# ---------------------------------------------------------------------------
# Kernel C (two-pass path, pass 2): standardize + sigmoid, lane-dense in/out.
#   mean / inv_std arrive as SMEM scalars; sigmoid via one EUP tanh.
# ---------------------------------------------------------------------------
def _apply_kernel(mean_ref, inv_ref, l_ref, o_ref):
    z = (l_ref[...] - mean_ref[0, 0]) * inv_ref[0, 0]
    o_ref[...] = 0.5 * (jnp.tanh(0.5 * z) + 1.0)


# ---------------------------------------------------------------------------
# Kernel D (fused path for slabs that fit VMEM): read HBM once, reduce + apply.
# ---------------------------------------------------------------------------
def _fused_kernel(scal_ref, l_ref, o_ref):
    n = scal_ref[0]
    c = scal_ref[1]
    y = l_ref[...] - c                        # pads == c -> y == 0
    s = jnp.sum(y)
    q = jnp.sum(y * y)
    d = s / n                                 # mean - c
    inv = lax.rsqrt((q - s * d) / (n - 1.0))
    z = (y - d) * inv                         # == (x - mean) * inv_std
    o_ref[...] = 0.5 * (jnp.tanh(0.5 * z) + 1.0)


# ---------------------------------------------------------------------------
# Wrapper
# ---------------------------------------------------------------------------
def linear_attention(x, edge_index, weight, bias, *,
                     tile_rows=1024,
                     tile_nodes=512,
                     fused_slab_bytes=4 * 1024 * 1024,
                     min_edges_for_pallas=0):
    """x: (N, D) f32, edge_index: (2, E) i32, weight: (2D, 1) f32, bias: (1,) f32.

    Returns (E,) f32, matching the torch module's output.
    """
    x = x.astype(jnp.float32)
    weight = weight.astype(jnp.float32)
    bias = bias.astype(jnp.float32)
    N, D = x.shape
    E = int(edge_index.shape[1])

    # --- hoisted linear layer: per-node scores s = x @ [Wu | Wv] (out_dim == 1) ---
    w2 = jnp.concatenate([weight[:D], weight[D:]], axis=1)           # (D, 2)

    if D >= 128:
        # MXU-friendly D: tiled, pipelined Pallas matmul over nodes ("parallel").
        n_pad8 = _round_up(N, 8)
        tn = min(tile_nodes, n_pad8)
        n_pad = _round_up(n_pad8, tn)
        x_pad = jnp.pad(x, ((0, n_pad - N), (0, 0)))
        scores = pl.pallas_call(
            _node_scores_kernel,
            out_shape=jax.ShapeDtypeStruct((n_pad, 2), jnp.float32),
            grid=(n_pad // tn,),
            in_specs=[pl.BlockSpec((tn, D), lambda i: (i, 0)),
                      pl.BlockSpec((D, 2), lambda i: (0, 0))],       # W resident
            out_specs=pl.BlockSpec((tn, 2), lambda i: (i, 0)),
            compiler_params=pltpu.CompilerParams(
                dimension_semantics=("parallel",)),
        )(x_pad, w2)
    else:
        # Skinny D: lanes/MXU would be <1% utilized and the (N,2) output a masked
        # 2-of-128-lane store stream; let XLA fuse the tiny matmul with the gather.
        scores = x @ w2

    # --- glue: two scalar gathers per edge + bias ---
    logits = (scores[:, 0][edge_index[0]]
              + scores[:, 1][edge_index[1]]
              + bias[0])                                             # (E,) f32

    if E < min_edges_for_pallas:
        # Tiny graphs: launch + padding overhead dominates; stay in XLA.
        mean = jnp.mean(logits)
        std = jnp.sqrt(jnp.sum((logits - mean) ** 2) / (E - 1))
        return jax.nn.sigmoid((logits - mean) / std)

    # --- lane-dense slab: 128 edges per row, padded with logits[0] so padding
    #     contributes exactly zero to the shifted sums ---
    c = logits[0]
    rows8 = _round_up(pl.cdiv(E, 128), 8)
    slab_bytes = rows8 * 128 * 4
    fused = slab_bytes <= fused_slab_bytes
    tile_r = rows8 if fused else min(tile_rows, rows8)
    rows_pad = _round_up(rows8, tile_r)
    num_tiles = rows_pad // tile_r
    pad_len = rows_pad * 128 - E
    l_pad = jnp.concatenate(
        [logits, jnp.full((pad_len,), c, jnp.float32)]).reshape(rows_pad, 128)

    # n and the shift live in SMEM (not baked into the kernel body).  For
    # variable-E workloads, bucket rows_pad upstream to keep the grid stable too.
    scal = jnp.stack([jnp.float32(E), c])                            # f32[2]

    if fused:
        # Slab resident in VMEM: one launch, one HBM read, one HBM write.
        out_pad = pl.pallas_call(
            _fused_kernel,
            out_shape=jax.ShapeDtypeStruct((rows_pad, 128), jnp.float32),
            grid=(1,),
            in_specs=[pl.BlockSpec(memory_space=pltpu.SMEM),
                      pl.BlockSpec((rows_pad, 128), lambda i: (0, 0))],
            out_specs=pl.BlockSpec((rows_pad, 128), lambda i: (0, 0)),
            compiler_params=pltpu.CompilerParams(
                dimension_semantics=("arbitrary",),
                vmem_limit_bytes=32 * 1024 * 1024),
        )(scal, l_pad)
    else:
        # Pass 1: shifted sum / sumsq -> mean, inv_std (reduction axis "arbitrary").
        # TODO(synk): on v7x, shard this pass across the 2 TensorCores (size-2
        # "parallel" leading axis with per-core partial sums) for ~2x HBM bandwidth.
        mean, inv_std = pl.pallas_call(
            _reduce_kernel,
            out_shape=(jax.ShapeDtypeStruct((1, 1), jnp.float32),
                       jax.ShapeDtypeStruct((1, 1), jnp.float32)),
            grid=(num_tiles,),
            in_specs=[pl.BlockSpec(memory_space=pltpu.SMEM),
                      pl.BlockSpec((tile_r, 128), lambda t: (t, 0))],
            out_specs=(pl.BlockSpec((1, 1), lambda t: (0, 0)),
                       pl.BlockSpec((1, 1), lambda t: (0, 0))),
            scratch_shapes=[pltpu.VMEM((8, 128), jnp.float32),
                            pltpu.VMEM((8, 128), jnp.float32)],
            compiler_params=pltpu.CompilerParams(
                dimension_semantics=("arbitrary",),
                vmem_limit_bytes=32 * 1024 * 1024),
        )(scal, l_pad)

        # Pass 2: standardize + sigmoid (lane-dense in/out, scalars from SMEM).
        out_pad = pl.pallas_call(
            _apply_kernel,
            out_shape=jax.ShapeDtypeStruct((rows_pad, 128), jnp.float32),
            grid=(num_tiles,),
            in_specs=[pl.BlockSpec(memory_space=pltpu.SMEM),
                      pl.BlockSpec(memory_space=pltpu.SMEM),
                      pl.BlockSpec((tile_r, 128), lambda t: (t, 0))],
            out_specs=pl.BlockSpec((tile_r, 128), lambda t: (t, 0)),
            compiler_params=pltpu.CompilerParams(
                dimension_semantics=("parallel",),
                vmem_limit_bytes=32 * 1024 * 1024),
        )(mean, inv_std, l_pad)

    return out_pad.reshape(-1)[:E]


def _reference(x, edge_index, weight, bias):
    # Pure-JAX reference (mirrors the torch forward exactly).
    u = x[edge_index[0]]
    v = x[edge_index[1]]
    cat = jnp.concatenate([u, v], axis=-1)
    logits = cat @ weight[:, 0] + bias[0]                            # (E,)
    mean = jnp.mean(logits)
    std = jnp.sqrt(jnp.sum((logits - mean) ** 2) / (logits.shape[0] - 1))
    return jax.nn.sigmoid((logits - mean) / std)


def _make_problem(key, in_dim, num_nodes, num_edges):
    kx, ke, kw, kb = jax.random.split(key, 4)
    bound = 1.0 / jnp.sqrt(2.0 * in_dim)
    weight = jax.random.uniform(kw, (2 * in_dim, 1), jnp.float32, -bound, bound)
    bias = jax.random.uniform(kb, (1,), jnp.float32, -bound, bound)
    x = jax.random.normal(kx, (num_nodes, in_dim), jnp.float32)
    edge_index = jax.random.randint(ke, (2, num_edges), 0, num_nodes, jnp.int32)
    return x, edge_index, weight, bias


if __name__ == "__main__":
    key = jax.random.PRNGKey(0)
    k1, k2 = jax.random.split(key)

    # Case 1: skinny D -> XLA node scores + fused Pallas standardize/sigmoid.
    x1, ei1, w1, b1 = _make_problem(k1, in_dim=8, num_nodes=32, num_edges=300)
    out1 = jax.block_until_ready(linear_attention(x1, ei1, w1, b1))
    ref1 = _reference(x1, ei1, w1, b1)
    assert out1.shape == (300,)
    assert jnp.allclose(out1, ref1, atol=1e-2, rtol=1e-2), (out1, ref1)

    # Case 2: D = 128 -> tiled Pallas node-scores matmul; force the two-pass
    # (reduce + apply) standardize path to exercise it as well.
    x2, ei2, w2_, b2 = _make_problem(k2, in_dim=128, num_nodes=256, num_edges=2048)
    out2 = jax.block_until_ready(
        linear_attention(x2, ei2, w2_, b2, fused_slab_bytes=0))
    ref2 = _reference(x2, ei2, w2_, b2)
    assert out2.shape == (2048,)
    assert jnp.allclose(out2, ref2, atol=1e-2, rtol=1e-2), (out2, ref2)

    print("KERNEL_OK")
</pallas_src>

<mosaic_0001>
module attributes {stable_mosaic.version = 11 : i64} {
  func.func @_fused_kernel(%arg0: i32, %arg1: memref<2xf32, #tpu.memory_space<smem>>, %arg2: memref<8x128xf32, #tpu.memory_space<vmem>>, %arg3: memref<8x128xf32, #tpu.memory_space<vmem>>) attributes {dimension_semantics = [#tpu.dimension_semantics<arbitrary>], iteration_bounds = array<i64: 1>, scalar_prefetch = 0 : i64, scratch_operands = 0 : i64, tpu.core_type = #tpu.core_type<tc>, window_params = [{transform_indices = @transform_0, window_bounds = array<i64: 2>}, {pipeline_mode = #tpu.pipeline_mode<synchronous>, transform_indices = @transform_1, window_bounds = array<i64: 8, 128>}, {pipeline_mode = #tpu.pipeline_mode<synchronous>, transform_indices = @transform_2, window_bounds = array<i64: 8, 128>}]} {
    %c0 = arith.constant 0 : index
    %0 = memref.load %arg1[%c0] : memref<2xf32, #tpu.memory_space<smem>>
    %c1 = arith.constant 1 : index
    %1 = memref.load %arg1[%c1] : memref<2xf32, #tpu.memory_space<smem>>
    %c0_0 = arith.constant 0 : index
    %c0_1 = arith.constant 0 : index
    %2 = vector.load %arg2[%c0_0, %c0_1] : memref<8x128xf32, #tpu.memory_space<vmem>>, vector<8x128xf32>
    %3 = vector.broadcast %1 : f32 to vector<8x128xf32>
    %4 = arith.subf %2, %3 : vector<8x128xf32>
    %5 = vector.shape_cast %4 : vector<8x128xf32> to vector<1x8x128xf32>
    %cst = arith.constant dense<0.000000e+00> : vector<1xf32>
    %6 = vector.multi_reduction <add>, %5, %cst [1, 2] : vector<1x8x128xf32> to vector<1xf32>
    %7 = vector.shape_cast %6 : vector<1xf32> to vector<1x1x1xf32>
    %8 = vector.extract %7[0, 0, 0] : f32 from vector<1x1x1xf32>
    %9 = arith.mulf %4, %4 : vector<8x128xf32>
    %10 = vector.shape_cast %9 : vector<8x128xf32> to vector<1x8x128xf32>
    %cst_2 = arith.constant dense<0.000000e+00> : vector<1xf32>
    %11 = vector.multi_reduction <add>, %10, %cst_2 [1, 2] : vector<1x8x128xf32> to vector<1xf32>
    %12 = vector.shape_cast %11 : vector<1xf32> to vector<1x1x1xf32>
    %13 = vector.extract %12[0, 0, 0] : f32 from vector<1x1x1xf32>
    %14 = arith.divf %8, %0 : f32
    %15 = arith.mulf %8, %14 : f32
    %16 = arith.subf %13, %15 : f32
    %cst_3 = arith.constant 1.000000e+00 : f32
    %17 = arith.subf %0, %cst_3 : f32
    %18 = arith.divf %16, %17 : f32
    %19 = math.rsqrt %18 : f32
    %20 = vector.broadcast %14 : f32 to vector<8x128xf32>
    %21 = arith.subf %4, %20 : vector<8x128xf32>
    %22 = vector.broadcast %19 : f32 to vector<8x128xf32>
    %23 = arith.mulf %21, %22 : vector<8x128xf32>
    %cst_4 = arith.constant 5.000000e-01 : f32
    %24 = vector.broadcast %cst_4 : f32 to vector<8x128xf32>
    %25 = arith.mulf %24, %23 : vector<8x128xf32>
    %26 = math.tanh %25 : vector<8x128xf32>
    %cst_5 = arith.constant 1.000000e+00 : f32
    %27 = vector.broadcast %cst_5 : f32 to vector<8x128xf32>
    %28 = arith.addf %26, %27 : vector<8x128xf32>
    %cst_6 = arith.constant 5.000000e-01 : f32
    %29 = vector.broadcast %cst_6 : f32 to vector<8x128xf32>
    %30 = arith.mulf %29, %28 : vector<8x128xf32>
    %c0_7 = arith.constant 0 : index
    %c0_8 = arith.constant 0 : index
    %31 = vector.load %arg3[%c0_7, %c0_8] : memref<8x128xf32, #tpu.memory_space<vmem>>, vector<8x128xf32>
    tpu.vector_store %arg3[%c0_7, %c0_8], %30 {strides = array<i32>} : memref<8x128xf32, #tpu.memory_space<vmem>>, vector<8x128xf32>,
    return
  }
  func.func @transform_0(%arg0: i32) -> i32 {
    %c0_i32 = arith.constant 0 : i32
    %c0_i32_0 = arith.constant 0 : i32
    return %c0_i32 : i32
  }
  func.func @transform_1(%arg0: i32) -> (i32, i32) {
    %c0_i32 = arith.constant 0 : i32
    %c0_i32_0 = arith.constant 0 : i32
    %c0_i32_1 = arith.constant 0 : i32
    return %c0_i32, %c0_i32_0 : i32, i32
  }
  func.func @transform_2(%arg0: i32) -> (i32, i32) {
    %c0_i32 = arith.constant 0 : i32
    %c0_i32_0 = arith.constant 0 : i32
    %c0_i32_1 = arith.constant 0 : i32
    return %c0_i32, %c0_i32_0 : i32, i32
  }
}

</mosaic_0001>

<bundles_post_ra>
// kernel: tpu_custom_call.1
= control target key start
LH: loop header
LB: loop body
LE: loop exit
PB: predicated region body
PF: predicated region fallthrough
CT: control target
= control target key end

     0   :  { %7 = vsyncpa [#allocation5], 0  ;;  %s202_s0 = inlined_call_operand.hbm [shape: f32[2], index: 0, kind: input, shape index: {}]   ;;  %s203_s1 = inlined_call_operand.hbm [shape: f32[8,128], index: 1, kind: input, shape index: {}]   ;;  %s204_s2 = inlined_call_operand.hbm [shape: f32[8,128], index: 2, kind: output, shape index: {}]  }
   0x1   :  { %8 = vsyncpa [#allocation3], 0 }
   0x2   :  { %9 = vsyncpa [#allocation4], 0  ;;  %s175_s9 = smov [#allocation2]   ;;  %s176_s12 = smov [#allocation6]  }
   0x3   :  { %17 = dma.hbm_to_smem %s202_s0, 16, %s175_s9, [#allocation5]  }
   0x4   :  { %s24_s13 = sshll.u32 %s176_s12, 4  ;;  %s25_s13 = int_to_ptr.vmem [resolvable:$true] %s24_s13 }
   0x5   :  { %s137_s14 = scalar_lea.vmem %s25_s13, 128  ;;  %p142_p1 = scmp.lt.s32.totalorder %s25_s13, %s25_s13 }
   0x6   :  { %p138_p0 = scmp.ne.s32.totalorder %s25_s13, %s137_s14  ;;  %p143_p2 = scmp.lt.s32.totalorder %s137_s14, %s137_s14 }
   0x8   :  { %p144_p3 = por %p143_p2, %p142_p1 }
   0xa   :  { %p145_p4 = pnand %p144_p3, %p138_p0 }
   0xc   :  { %148 = shalt.err (!%p145_p4)
}
   0xd   :  { %27 = dma.hbm_to_vmem [thread:$0]  %s203_s1, 128, %s25_s13, [#allocation3]  }
   0xe   :  { %169 = dma.done.wait [#allocation5], 16  }
   0xf   :  { %170 = vsyncadd [#allocation5], 4294967280 }
  0x10   :  { %171 = dma.done.wait [#allocation3], 128  }
  0x11   :  { %172 = vsyncadd [#allocation3], 4294967168 }
  0x12   :  { %34 = sfence }
  0x13   :  { %s98_s0 = sld [smem:[#allocation2 + $0x1]]  ;;  %v37_v0 = vld [vmem:[#allocation6] sm:$0xff]  ;;  %s177_s27 = smov [#allocation7]  }
  0x14   :  { %s35_s17 = sld [smem:[#allocation2]]  ;;  %s88_s28 = sshll.u32 %s177_s27, 4  ;;  %s89_s28 = int_to_ptr.vmem [resolvable:$true] %s88_s28 }
  0x15   :  { %s149_s29 = scalar_lea.vmem %s89_s28, 128  ;;  %p154_p6 = scmp.lt.s32.totalorder %s89_s28, %s89_s28 }
  0x16   :  { %p150_p5 = scmp.ne.s32.totalorder %s89_s28, %s149_s29  ;;  %p155_p7 = scmp.lt.s32.totalorder %s149_s29, %s149_s29 }
  0x18   :  { %p156_p8 = por %p155_p7, %p154_p6 }
  0x19   :  { %v38_v1 = vstv %s98_s0 }
  0x1a   :  { %v39_v2 = vsub.f32 %v37_v0, %v38_v1  ;;  %s99_s18 = sadd.f32 -1.0, %s35_s17  ;;  %v59_v4 = vstv %s35_s17  ;;  %p157_p9 = pnand %p156_p8, %p150_p5 }
  0x1b   :  { %113 = vrcp.f32 %v59_v4 }
  0x1c   :  { %40 = vadd.xlane.f32.xlu0 %v39_v2  ;;  %v49_v3 = vmul.f32 %v39_v2, %v39_v2  ;;  %v66_v6 = vstv %s99_s18 }
  0x1d   :  { %115 = vrcp.f32 %v66_v6 }
  0x20   :  { %50 = vadd.xlane.f32.xlu0 %v49_v3 }
  0x28   :  { %v114_v19 = vpop.eup %113 }
  0x2a   :  { %v116_v21 = vpop.eup %115 }
  0xa5   :  { %v41_v5 = vpop.xlane.xlu0 %40 }
  0xa6   :  { %v42_v7 = vrot.slane %v41_v5, 4 }
  0xa8   :  { %v43_v8 = vadd.f32 %v42_v7, %v41_v5 }
  0xa9   :  { %v51_v9 = vpop.xlane.xlu0 %50 }
  0xaa   :  { %v44_v10 = vrot.slane %v43_v8, 2  ;;  %v52_v11 = vrot.slane %v51_v9, 4 }
  0xac   :  { %v53_v12 = vadd.f32 %v52_v11, %v51_v9  ;;  %v45_v13 = vadd.f32 %v44_v10, %v43_v8 }
  0xae   :  { %v54_v14 = vrot.slane %v53_v12, 2  ;;  %v46_v15 = vrot.slane %v45_v13, 1 }
  0xb0   :  { %v55_v16 = vadd.f32 %v54_v14, %v53_v12  ;;  %v47_v17 = vadd.f32 %v46_v15, %v45_v13 }
  0xb2   :  { %100 = vpush %v47_v17  ;;  %v56_v18 = vrot.slane %v55_v16, 1 }
  0xb4   :  { %v57_v20 = vadd.f32 %v56_v18, %v55_v16 }
  0xb6   :  { %102 = vpush %v57_v20 }
  0xb7   :  { %104 = vpush %v114_v19 }
  0xb8   :  { %106 = vpush %v116_v21 }
  0xe3   :  { %s101_s1 = spop %100 }
  0xe7   :  { %s103_s19 = spop %102 }
  0xe8   :  { %s105_s20 = spop %104 }
  0xe9   :  { %s62_s21 = smul.f32 %s105_s20, %s101_s1  ;;  %s107_s23 = spop %106 }
  0xeb   :  { %s63_s22 = smul.f32 %s101_s1, %s62_s21  ;;  %v73_v24 = vstv %s62_s21 }
  0xec   :  { %v74_v25 = vsub.f32 %v39_v2, %v73_v24 }
  0xed   :  { %s64_s24 = ssub.f32 %s103_s19, %s63_s22 }
  0xef   :  { %s69_s25 = smul.f32 %s107_s23, %s64_s24 }
  0xf1   :  { %v70_v22 = vstv %s69_s25 }
  0xf2   :  { %117 = vrsqrt.f32 %v70_v22 }
  0xff   :  { %v118_v23 = vpop.eup %117 }
 0x100   :  { %108 = vpush %v118_v23 }
 0x131   :  { %s109_s26 = spop %108 }
 0x132   :  { %v75_v26 = vstv %s109_s26 }
 0x133   :  { %v76_v27 = vmul.f32 %v75_v26, %v74_v25 }
 0x135   :  { %v77_v28 = vmul.f32 0.5, %v76_v27 }
 0x137   :  { %119 = vtanh.f32 %v77_v28 }
 0x144   :  { %v120_v29 = vpop.eup %119 }
 0x145   :  { %v79_v30 = vadd.f32 1.0, %v120_v29 }
 0x147   :  { %v80_v31 = vmul.f32 0.5, %v79_v30 }
 0x149   :  { %81 = vst [vmem:[#allocation7] sm:$0xff] %v80_v31 }
 0x14a   :  { %160 = shalt.err (!%p157_p9)
}
 0x14b   :  { %91 = dma.vmem_to_hbm [thread:$0]  %s89_s28, 128, %s204_s2, [#allocation4]  }
 0x14c   :  { %173 = dma.done.wait [#allocation4], 128  }
 0x14d   :  { %174 = vsyncadd [#allocation4], 4294967168 }
 0x14e   :  { %95 = vsyncpa [#allocation3], 1 }
 0x14f   :  { %96 = vsyncpa [#allocation4], 1 }
 0x150   :  { %97 = vsyncpa [#allocation5], 1 }

</bundles_post_ra>
